<compile_context>
chip_gen: v7x
topology: tpu7x:2x2x1
jax: 0.10.0
libtpu: 0.0.40
codegen_flags: <defaults>
</compile_context>

<pallas_src>
import functools
import math

import jax
import jax.numpy as jnp
from jax.experimental import pallas as pl
from jax.experimental.pallas import tpu as pltpu

_VMEM_LIMIT_BYTES = 32 * 1024 * 1024   # safe on v5e/v6e (128 MiB) and v7x (64 MiB/TC)
_TILE_TARGET = 1024                    # 1024x1024 f32 out block = 4 MiB (x2 buffers)
_LANE = 128                            # adjacency dims are padded to this multiple


def _round_up(n, m):
    return ((n + m - 1) // m) * m


def _pick_tile(n, target, granule):
    """Largest divisor of n that is <= target and a multiple of `granule`.
    Falls back to the full extent n (always a legal block dim)."""
    if n <= target:
        return n
    for t in range(min(target, n), granule - 1, -1):
        if n % t == 0 and t % granule == 0:
            return t
    return n


def _pack_weights(w1, b1, w2, b2):
    """Fuse lin1/lin2: Wc = [W1^T | W2^T] in [xd, 2*dim], bc = [b1 | b2] in [1, 2*dim]."""
    wc = jnp.concatenate([w1.T, w2.T], axis=1).astype(jnp.float32)
    bc = jnp.concatenate([b1, b2]).reshape(1, -1).astype(jnp.float32)
    return wc, bc


# --------------------------- kernel 0: fused projections ---------------------
def _projection_kernel(x_ref, wc_ref, bc_ref, m1_ref, m2_ref, *, alpha1, dim):
    """M = tanh(alpha1 * (X @ Wc + bc)); split into M1 (lin1) / M2 (lin2) as bf16."""
    m = jnp.tanh(alpha1 * (jnp.dot(x_ref[...], wc_ref[...],
                                   preferred_element_type=jnp.float32) + bc_ref[...]))
    m1_ref[...] = m[:, :dim].astype(jnp.bfloat16)
    m2_ref[...] = m[:, dim:].astype(jnp.bfloat16)


def _project(xp, wc, bc, *, dim, alpha1, tile_target=_TILE_TARGET):
    n_pad, xd = xp.shape
    tp = _pick_tile(n_pad, tile_target, _LANE)
    return pl.pallas_call(
        functools.partial(_projection_kernel, alpha1=alpha1, dim=dim),
        out_shape=(jax.ShapeDtypeStruct((n_pad, dim), jnp.bfloat16),
                   jax.ShapeDtypeStruct((n_pad, dim), jnp.bfloat16)),
        grid=(n_pad // tp,),
        in_specs=[pl.BlockSpec((tp, xd), lambda i: (i, 0)),        # X row tile
                  pl.BlockSpec((xd, 2 * dim), lambda i: (0, 0)),   # fused weights
                  pl.BlockSpec((1, 2 * dim), lambda i: (0, 0))],   # fused bias
        out_specs=(pl.BlockSpec((tp, dim), lambda i: (i, 0)),
                   pl.BlockSpec((tp, dim), lambda i: (i, 0))),
        compiler_params=pltpu.CompilerParams(
            dimension_semantics=("parallel",),
            vmem_limit_bytes=_VMEM_LIMIT_BYTES),
    )(xp, wc, bc)


# --------------------------- kernel 1: dense adjacency -----------------------
def _scores_kernel(m1_ref, m2_ref, a_ref, *, alpha2, n_real):
    """A_tile = sigmoid(alpha2 * M1_i @ M2_j^T); padded rows/cols forced to 0."""
    # m1 @ m2^T without materializing a transpose: contract on the dim axis,
    # bf16 operands, f32 accumulate on the MXU.
    scores = jax.lax.dot_general(m1_ref[...], m2_ref[...], (((1,), (1,)), ((), ())),
                                 preferred_element_type=jnp.float32)   # [tm, tn]
    # sigmoid(x) == 0.5 * tanh(0.5*x) + 0.5  -> single EUP transcendental.
    a_ref[...] = 0.5 * jnp.tanh((0.5 * alpha2) * scores) + 0.5

    tm, tn = a_ref.shape
    row0 = pl.program_id(0) * tm
    col0 = pl.program_id(1) * tn

    # Only edge blocks touching the padded strip pay for iota/compare/select.
    @pl.when(jnp.logical_or(row0 + tm > n_real, col0 + tn > n_real))
    def _():
        row = row0 + jax.lax.broadcasted_iota(jnp.int32, (tm, tn), 0)
        col = col0 + jax.lax.broadcasted_iota(jnp.int32, (tm, tn), 1)
        keep = jnp.logical_and(row < n_real, col < n_real)
        a_ref[...] = jnp.where(keep, a_ref[...], 0.0)


def _dense_adjacency(m1, m2, n_real, *, alpha2, tile_target=_TILE_TARGET):
    n_pad, dim = m1.shape
    tm = _pick_tile(n_pad, tile_target, _LANE)
    tn = _pick_tile(n_pad, tile_target, _LANE)
    grid = (n_pad // tm, n_pad // tn)
    return pl.pallas_call(
        functools.partial(_scores_kernel, alpha2=alpha2, n_real=n_real),
        out_shape=jax.ShapeDtypeStruct((n_pad, n_pad), jnp.float32),
        grid=grid,
        in_specs=[pl.BlockSpec((tm, dim), lambda i, j: (i, 0)),   # M1 rows (row tile)
                  pl.BlockSpec((tn, dim), lambda i, j: (j, 0))],  # M2 rows (col tile)
        out_specs=pl.BlockSpec((tm, tn), lambda i, j: (i, j)),
        compiler_params=pltpu.CompilerParams(
            dimension_semantics=("parallel", "parallel"),
            vmem_limit_bytes=_VMEM_LIMIT_BYTES),
    )(m1, m2)


# ----------------------- kernel 2: sparsify + self-loop clamp ----------------
def _mask_clamp_kernel(a_ref, mask_ref, o_ref, *, self_loops):
    """A := A * mask (int8 0/1 mask); then clamp diagonal entries to >= 0.5."""
    o = jnp.where(mask_ref[...] != 0, a_ref[...], 0.0)
    if self_loops:
        tm, tn = o_ref.shape
        row0 = pl.program_id(0) * tm
        # Full-row blocks: every block contains its slice of the diagonal.
        row = row0 + jax.lax.broadcasted_iota(jnp.int32, (tm, tn), 0)
        col = jax.lax.broadcasted_iota(jnp.int32, (tm, tn), 1)
        o = jnp.where(row == col, jnp.maximum(o, 0.5), o)
    o_ref[...] = o


def _apply_mask_clamp(dense_a, mask_i8, *, self_loops):
    n_pad = dense_a.shape[0]
    # Full-row lane-dense blocks on a 1-D grid; size rows so the f32 block ~2 MiB.
    row_target = max(32, (2 * 1024 * 1024) // (4 * n_pad))
    tr = _pick_tile(n_pad, row_target, 32)   # 32 also covers int8 sublane tiling
    return pl.pallas_call(
        functools.partial(_mask_clamp_kernel, self_loops=self_loops),
        out_shape=jax.ShapeDtypeStruct((n_pad, n_pad), jnp.float32),
        grid=(n_pad // tr,),
        in_specs=[pl.BlockSpec((tr, n_pad), lambda i: (i, 0)),
                  pl.BlockSpec((tr, n_pad), lambda i: (i, 0))],
        out_specs=pl.BlockSpec((tr, n_pad), lambda i: (i, 0)),
        input_output_aliases={0: 0},   # mask/clamp in place on dense_a (donated!)
        compiler_params=pltpu.CompilerParams(
            dimension_semantics=("parallel",),
            vmem_limit_bytes=_VMEM_LIMIT_BYTES),
    )(dense_a, mask_i8)


# --------------------------------- forward -----------------------------------
def adjacency_learner_forward(static_features, w1, b1, w2, b2, *, num_edges,
                              alpha1=0.1, alpha2=2.0, self_loops=True,
                              tile_target=_TILE_TARGET):
    x = static_features.astype(jnp.float32)
    n = x.shape[0]
    dim = w1.shape[0]
    n_pad = _round_up(n, _LANE)                       # lane-dense padded node count
    wc, bc = _pack_weights(w1, b1, w2, b2)
    xp = jnp.pad(x, ((0, n_pad - n), (0, 0)))         # padded A entries zeroed in kernel 1

    # Kernel 0: fused lin1/lin2 projection + tanh, bf16 M1/M2 (computed once).
    m1, m2 = _project(xp, wc, bc, dim=dim, alpha1=alpha1, tile_target=tile_target)

    # Kernel 1: dense adjacency on the padded, lane-dense [n_pad, n_pad] grid.
    dense_p = _dense_adjacency(m1, m2, n, alpha2=alpha2, tile_target=tile_target)

    # TODO(synk): a scalar threshold (top_k values[k-1] in SMEM) would remove this
    # N^2 scatter + int8 mask read, but ties at the k-th value would keep more
    # than num_edges edges; exact torch.topk semantics kept instead.  Padded
    # entries are exactly 0.0 (< any sigmoid output) so they are never selected.
    _, strongest = jax.lax.top_k(dense_p.reshape(-1), num_edges)
    mask = jnp.zeros((n_pad * n_pad,), jnp.int8).at[strongest].set(1).reshape(n_pad, n_pad)

    # Kernel 2: sparsify + self-loop clamp (in place on dense_p), then un-pad.
    a_p = _apply_mask_clamp(dense_p, mask, self_loops=self_loops)
    return a_p[:n, :n]


if __name__ == "__main__":
    alpha1, alpha2 = 0.1, 2.0
    xd, dim = 8, 32

    # Module's native tiny shape, plus a non-multiple-of-128 size to exercise
    # the lane-padding / edge-block-zeroing path.
    for num_nodes, max_num_edges in [(16, 40), (200, 520)]:
        key = jax.random.PRNGKey(0)
        k_x, k_w1, k_b1, k_w2, k_b2 = jax.random.split(key, 5)

        static_features = jax.random.normal(k_x, (num_nodes, xd), dtype=jnp.float32)

        # nn.Linear(xd, dim): weight [dim, xd], bias [dim]; PyTorch-style uniform init.
        bound = 1.0 / math.sqrt(xd)
        w1 = jax.random.uniform(k_w1, (dim, xd), minval=-bound, maxval=bound, dtype=jnp.float32)
        b1 = jax.random.uniform(k_b1, (dim,), minval=-bound, maxval=bound, dtype=jnp.float32)
        w2 = jax.random.uniform(k_w2, (dim, xd), minval=-bound, maxval=bound, dtype=jnp.float32)
        b2 = jax.random.uniform(k_b2, (dim,), minval=-bound, maxval=bound, dtype=jnp.float32)

        # --- kernels 0+1 vs. pure-f32 JAX reference (bf16 scores tolerance) ----
        n_pad = _round_up(num_nodes, _LANE)
        xp = jnp.pad(static_features, ((0, n_pad - num_nodes), (0, 0)))
        wc, bc = _pack_weights(w1, b1, w2, b2)
        m1, m2 = _project(xp, wc, bc, dim=dim, alpha1=alpha1)
        dense_p = jax.block_until_ready(
            _dense_adjacency(m1, m2, num_nodes, alpha2=alpha2))

        m1_ref = jnp.tanh(alpha1 * (static_features @ w1.T + b1))
        m2_ref = jnp.tanh(alpha1 * (static_features @ w2.T + b2))
        dense_ref = jax.nn.sigmoid(alpha2 * (m1_ref @ m2_ref.T))
        assert bool(jnp.allclose(dense_p[:num_nodes, :num_nodes], dense_ref, atol=2e-2)), \
            "dense adjacency mismatch"
        assert bool(jnp.all(dense_p[num_nodes:, :] == 0.0)), "padded rows not zeroed"
        assert bool(jnp.all(dense_p[:, num_nodes:] == 0.0)), "padded cols not zeroed"

        # --- exact reference for top-k mask + self-loop clamp ------------------
        _, idxs = jax.lax.top_k(dense_p.reshape(-1), max_num_edges)
        mask = jnp.zeros((n_pad * n_pad,), jnp.int8).at[idxs].set(1).reshape(n_pad, n_pad)
        masked_ref = jnp.where(mask != 0, dense_p, 0.0)[:num_nodes, :num_nodes]
        eye = jnp.eye(num_nodes, dtype=bool)
        masked_ref = jax.block_until_ready(
            jnp.where(eye, jnp.maximum(masked_ref, 0.5), masked_ref))

        # --- full forward (recomputes the same dense path deterministically) ---
        A = jax.block_until_ready(adjacency_learner_forward(
            static_features, w1, b1, w2, b2,
            num_edges=max_num_edges, alpha1=alpha1, alpha2=alpha2, self_loops=True))

        assert A.shape == (num_nodes, num_nodes)
        assert bool(jnp.all(jnp.isfinite(A)))
        assert bool(jnp.all(jnp.diag(A) >= 0.5))           # self-loop clamp
        assert int(jnp.sum(A > 0)) >= max_num_edges        # kept edges (+ diagonal)
        assert bool(jnp.allclose(A, masked_ref, atol=1e-6)), "mask/clamp mismatch"

    print("KERNEL_OK")
</pallas_src>

<mosaic_0001>
module attributes {stable_mosaic.version = 11 : i64} {
  func.func @_projection_kernel(%arg0: i32, %arg1: memref<128x8xf32, #tpu.memory_space<vmem>>, %arg2: memref<8x64xf32, #tpu.memory_space<vmem>>, %arg3: memref<1x64xf32, #tpu.memory_space<vmem>>, %arg4: memref<128x32xbf16, #tpu.memory_space<vmem>>, %arg5: memref<128x32xbf16, #tpu.memory_space<vmem>>) attributes {dimension_semantics = [#tpu.dimension_semantics<parallel>], iteration_bounds = array<i64: 1>, scalar_prefetch = 0 : i64, scratch_operands = 0 : i64, tpu.core_type = #tpu.core_type<tc>, window_params = [{transform_indices = @transform_0, window_bounds = array<i64: 128, 8>}, {pipeline_mode = #tpu.pipeline_mode<synchronous>, transform_indices = @transform_1, window_bounds = array<i64: 8, 64>}, {pipeline_mode = #tpu.pipeline_mode<synchronous>, transform_indices = @transform_2, window_bounds = array<i64: 1, 64>}, {transform_indices = @transform_3, window_bounds = array<i64: 128, 32>}, {transform_indices = @transform_4, window_bounds = array<i64: 128, 32>}]} {
    %c0 = arith.constant 0 : index
    %c0_0 = arith.constant 0 : index
    %0 = vector.load %arg1[%c0, %c0_0] : memref<128x8xf32, #tpu.memory_space<vmem>>, vector<128x8xf32>
    %c0_1 = arith.constant 0 : index
    %c0_2 = arith.constant 0 : index
    %1 = vector.load %arg2[%c0_1, %c0_2] : memref<8x64xf32, #tpu.memory_space<vmem>>, vector<8x64xf32>
    %cst = arith.constant dense<0.000000e+00> : vector<128x64xf32>
    %2 = tpu.matmul %0, %1, %cst {dimension_numbers = #tpu.dot_dimension_numbers<[1], [0], [0], [1], [0, 0, 1, 1], [], []>} : vector<128x8xf32>, vector<8x64xf32>, vector<128x64xf32> -> vector<128x64xf32>
    %c0_3 = arith.constant 0 : index
    %c0_4 = arith.constant 0 : index
    %3 = vector.load %arg3[%c0_3, %c0_4] : memref<1x64xf32, #tpu.memory_space<vmem>>, vector<1x64xf32>
    %4 = vector.broadcast %3 : vector<1x64xf32> to vector<128x64xf32>
    %5 = arith.addf %2, %4 : vector<128x64xf32>
    %cst_5 = arith.constant 1.000000e-01 : f32
    %6 = vector.broadcast %cst_5 : f32 to vector<128x64xf32>
    %7 = arith.mulf %6, %5 : vector<128x64xf32>
    %8 = math.tanh %7 : vector<128x64xf32>
    %9 = vector.extract_strided_slice %8 {offsets = [0, 0], sizes = [128, 32], strides = [1, 1]} : vector<128x64xf32> to vector<128x32xf32>
    %10 = arith.truncf %9 : vector<128x32xf32> to vector<128x32xbf16>
    %c0_6 = arith.constant 0 : index
    %c0_7 = arith.constant 0 : index
    %11 = vector.load %arg4[%c0_6, %c0_7] : memref<128x32xbf16, #tpu.memory_space<vmem>>, vector<128x32xbf16>
    tpu.vector_store %arg4[%c0_6, %c0_7], %10 {strides = array<i32>} : memref<128x32xbf16, #tpu.memory_space<vmem>>, vector<128x32xbf16>,
    %12 = vector.extract_strided_slice %8 {offsets = [0, 32], sizes = [128, 32], strides = [1, 1]} : vector<128x64xf32> to vector<128x32xf32>
    %13 = arith.truncf %12 : vector<128x32xf32> to vector<128x32xbf16>
    %c0_8 = arith.constant 0 : index
    %c0_9 = arith.constant 0 : index
    %14 = vector.load %arg5[%c0_8, %c0_9] : memref<128x32xbf16, #tpu.memory_space<vmem>>, vector<128x32xbf16>
    tpu.vector_store %arg5[%c0_8, %c0_9], %13 {strides = array<i32>} : memref<128x32xbf16, #tpu.memory_space<vmem>>, vector<128x32xbf16>,
    return
  }
  func.func @transform_0(%arg0: i32) -> (i32, i32) {
    %c0_i32 = arith.constant 0 : i32
    %c0_i32_0 = arith.constant 0 : i32
    return %arg0, %c0_i32 : i32, i32
  }
  func.func @transform_1(%arg0: i32) -> (i32, i32) {
    %c0_i32 = arith.constant 0 : i32
    %c0_i32_0 = arith.constant 0 : i32
    %c0_i32_1 = arith.constant 0 : i32
    return %c0_i32, %c0_i32_0 : i32, i32
  }
  func.func @transform_2(%arg0: i32) -> (i32, i32) {
    %c0_i32 = arith.constant 0 : i32
    %c0_i32_0 = arith.constant 0 : i32
    %c0_i32_1 = arith.constant 0 : i32
    return %c0_i32, %c0_i32_0 : i32, i32
  }
  func.func @transform_3(%arg0: i32) -> (i32, i32) {
    %c0_i32 = arith.constant 0 : i32
    %c0_i32_0 = arith.constant 0 : i32
    return %arg0, %c0_i32 : i32, i32
  }
  func.func @transform_4(%arg0: i32) -> (i32, i32) {
    %c0_i32 = arith.constant 0 : i32
    %c0_i32_0 = arith.constant 0 : i32
    return %arg0, %c0_i32 : i32, i32
  }
}

</mosaic_0001>

<bundles_post_ra>
// kernel: tpu_custom_call.1
= control target key start
LH: loop header
LB: loop body
LE: loop exit
PB: predicated region body
PF: predicated region fallthrough
CT: control target
= control target key end

     0   :  { %vm40_vm0 = vcmask 64512   ;;  %vm330_vm1 = vcmask 257024   ;;  %s786_s1 = inlined_call_operand.vmem [shape: f32[8,64], index: 1, kind: input, shape index: {}]   ;;  %s787_s0 = inlined_call_operand.vmem [shape: f32[128,8], index: 0, kind: input, shape index: {}]   ;;  %s788_s2 = inlined_call_operand.vmem [shape: f32[1,64], index: 2, kind: input, shape index: {}]   ;;  %s789_s3 = inlined_call_operand.vmem [shape: bf16[128,32], index: 3, kind: output, shape index: {0}]   ;;  %s790_s4 = inlined_call_operand.vmem [shape: bf16[128,32], index: 4, kind: output, shape index: {1}]  }
   0x1   :  { %v32_v0 = vld [vmem:[%s786_s1] sm:$0xff]  ;;  %v17_v3 = vld [vmem:[%s787_s0 + $0x8] sm:$0xff]  ;;  %v18_v5 = vld [vmem:[%s787_s0 + $0x10] sm:$0xff] }
   0x2   :  { %v16_v1 = vld [vmem:[%s787_s0] sm:$0xff]  ;;  %485 = vmatprep.subr.mxu0 %v32_v0  ;;  %511 = vmatprep.subr.mxu1 %v32_v0  ;;  %v25_v4 = vld [vmem:[%s787_s0 + $0x48] sm:$0xff]  ;;  %v26_v6 = vld [vmem:[%s787_s0 + $0x50] sm:$0xff] }
   0x3   :  { %v24_v2 = vld [vmem:[%s787_s0 + $0x40] sm:$0xff]  ;;  %486 = vmatpush3.msra.mxu0 %v32_v0  ;;  %512 = vmatpush3.msra.mxu1 %v32_v0  ;;  %v19_v7 = vld [vmem:[%s787_s0 + $0x18] sm:$0xff]  ;;  %v21_v11 = vld [vmem:[%s787_s0 + $0x28] sm:$0xff] }
   0x4   :  { %487 = vmatprep.mubr.msk.f32.mxu0 %vm40_vm0, %v16_v1  ;;  %499 = vmatprep.mubr.msk.f32.mxu1 %vm40_vm0, %v24_v2  ;;  %v27_v8 = vld [vmem:[%s787_s0 + $0x58] sm:$0xff]  ;;  %v20_v9 = vld [vmem:[%s787_s0 + $0x20] sm:$0xff]  ;;  %v29_v12 = vld [vmem:[%s787_s0 + $0x68] sm:$0xff] }
   0x5   :  { %488 = vmatmul.mubr.msk.f32.vlgmr.msra.gmra.mrb[0].mxu0 %vm40_vm0, %v17_v3  ;;  %500 = vmatmul.mubr.msk.f32.vlgmr.msra.gmra.mrb[0].mxu1 %vm40_vm0, %v25_v4  ;;  %v28_v10 = vld [vmem:[%s787_s0 + $0x60] sm:$0xff]  ;;  %v22_v13 = vld [vmem:[%s787_s0 + $0x30] sm:$0xff]  ;;  %v23_v15 = vld [vmem:[%s787_s0 + $0x38] sm:$0xff] }
   0x6   :  { %490 = vmatprep.mubr.msk.f32.mxu0 %vm40_vm0, %v18_v5  ;;  %502 = vmatprep.mubr.msk.f32.mxu1 %vm40_vm0, %v26_v6  ;;  %v30_v14 = vld [vmem:[%s787_s0 + $0x70] sm:$0xff]  ;;  %v31_v16 = vld [vmem:[%s787_s0 + $0x78] sm:$0xff]  ;;  %v419_v17 = vld [vmem:[%s788_s2] ss:$0 sm:$0xff]  ;;  %s546_s0 = smov 96  }
   0x9   :  { %491 = vmatmul.mubr.msk.f32.gmra.mrb[2].mxu0 %vm40_vm0, %v19_v7  ;;  %503 = vmatmul.mubr.msk.f32.gmra.mrb[2].mxu1 %vm40_vm0, %v27_v8 }
   0xa   :  { %493 = vmatprep.mubr.msk.f32.mxu0 %vm40_vm0, %v20_v9  ;;  %505 = vmatprep.mubr.msk.f32.mxu1 %vm40_vm0, %v28_v10 }
   0xd   :  { %494 = vmatmul.mubr.msk.f32.gmra.mrb[4].mxu0 %vm40_vm0, %v21_v11  ;;  %506 = vmatmul.mubr.msk.f32.gmra.mrb[4].mxu1 %vm40_vm0, %v29_v12 }
   0xe   :  { %496 = vmatprep.mubr.msk.f32.mxu0 %vm40_vm0, %v22_v13  ;;  %508 = vmatprep.mubr.msk.f32.mxu1 %vm40_vm0, %v30_v14 }
  0x11   :  { %497 = vmatmul.mubr.msk.f32.gmra.mrb[6].mxu0 %vm40_vm0, %v23_v15  ;;  %509 = vmatmul.mubr.msk.f32.gmra.mrb[6].mxu1 %vm40_vm0, %v31_v16 }
  0xd8   :  { %v489_v18 = vpop.f32.mrb[0].mxu0  ;;  %v501_v19 = vpop.f32.mrb[0].mxu1 }
  0xd9   :  { %v161_v20 = vadd.f32 %v489_v18, %v419_v17  ;;  %v201_v21 = vadd.f32 %v501_v19, %v419_v17  ;;  %v155_v22 = vpop.f32.mrb[1].mxu0  ;;  %v195_v23 = vpop.f32.mrb[1].mxu1 }
  0xda   :  { %v156_v24 = vadd.f32 %v419_v17, %v155_v22  ;;  %v196_v25 = vadd.f32 %v419_v17, %v195_v23 }
  0xdb   :  { %v235_v26 = vmul.f32 0.1, %v161_v20  ;;  %v243_v27 = vmul.f32 0.1, %v201_v21 }
  0xdc   :  { %v234_v28 = vmul.f32 0.1, %v156_v24  ;;  %v242_v29 = vmul.f32 0.1, %v196_v25  ;;  %v492_v30 = vpop.f32.mrb[2].mxu0  ;;  %v504_v31 = vpop.f32.mrb[2].mxu1 }
  0xdd   :  { %514 = vtanh.f32 %v235_v26  ;;  %v171_v32 = vadd.f32 %v492_v30, %v419_v17  ;;  %v165_v33 = vpop.f32.mrb[3].mxu0  ;;  %v211_v34 = vadd.f32 %v504_v31, %v419_v17  ;;  %v205_v35 = vpop.f32.mrb[3].mxu1 }
  0xde   :  { %516 = vtanh.f32 %v243_v27  ;;  %v166_v36 = vadd.f32 %v419_v17, %v165_v33  ;;  %v206_v37 = vadd.f32 %v419_v17, %v205_v35 }
  0xdf   :  { %518 = vtanh.f32 %v234_v28  ;;  %v237_v38 = vmul.f32 0.1, %v171_v32  ;;  %v245_v39 = vmul.f32 0.1, %v211_v34 }
  0xe0   :  { %520 = vtanh.f32 %v242_v29  ;;  %v236_v40 = vmul.f32 0.1, %v166_v36  ;;  %v244_v41 = vmul.f32 0.1, %v206_v37  ;;  %v495_v42 = vpop.f32.mrb[4].mxu0  ;;  %v507_v43 = vpop.f32.mrb[4].mxu1 }
  0xe1   :  { %522 = vtanh.f32 %v237_v38  ;;  %v181_v44 = vadd.f32 %v495_v42, %v419_v17  ;;  %v175_v45 = vpop.f32.mrb[5].mxu0  ;;  %v221_v46 = vadd.f32 %v507_v43, %v419_v17  ;;  %v215_v47 = vpop.f32.mrb[5].mxu1 }
  0xe2   :  { %524 = vtanh.f32 %v236_v40  ;;  %v176_v48 = vadd.f32 %v419_v17, %v175_v45  ;;  %v216_v49 = vadd.f32 %v419_v17, %v215_v47 }
  0xe3   :  { %526 = vtanh.f32 %v245_v39  ;;  %v239_v50 = vmul.f32 0.1, %v181_v44  ;;  %v247_v51 = vmul.f32 0.1, %v221_v46 }
  0xe4   :  { %528 = vtanh.f32 %v244_v41  ;;  %v238_v52 = vmul.f32 0.1, %v176_v48  ;;  %v246_v53 = vmul.f32 0.1, %v216_v49  ;;  %v498_v54 = vpop.f32.mrb[6].mxu0  ;;  %v510_v55 = vpop.f32.mrb[6].mxu1 }
  0xe5   :  { %530 = vtanh.f32 %v239_v50  ;;  %v191_v56 = vadd.f32 %v498_v54, %v419_v17  ;;  %v185_v57 = vpop.f32.mrb[7].mxu0  ;;  %v231_v58 = vadd.f32 %v510_v55, %v419_v17  ;;  %v225_v59 = vpop.f32.mrb[7].mxu1 }
  0xe6   :  { %532 = vtanh.f32 %v238_v52  ;;  %v186_v60 = vadd.f32 %v419_v17, %v185_v57  ;;  %v226_v61 = vadd.f32 %v419_v17, %v225_v59 }
  0xe7   :  { %v515_v62 = vpop.eup %514  ;;  %534 = vtanh.f32 %v247_v51  ;;  %v241_v63 = vmul.f32 0.1, %v191_v56  ;;  %v249_v0 = vmul.f32 0.1, %v231_v58 }
  0xe8   :  { %v517_v1 = vpop.eup %516  ;;  %v453_v2 = vpack.c.bf16 %v515_v62, %v515_v62  ;;  %536 = vtanh.f32 %v246_v53  ;;  %v240_v3 = vmul.f32 0.1, %v186_v60  ;;  %v248_v4 = vmul.f32 0.1, %v226_v61 }
  0xe9   :  { %v519_v5 = vpop.eup %518  ;;  %v461_v6 = vpack.c.bf16 %v517_v1, %v517_v1  ;;  %538 = vtanh.f32 %v241_v63 }
  0xea   :  { %v521_v7 = vpop.eup %520  ;;  %349 = vrot.lane.b32.xlu0 %v453_v2, %s546_s0  ;;  %332 = vst.msk [vmem:[%s789_s3 + $0x4] sm:$0xf] %vm330_vm1, %v453_v2  ;;  %v452_v8 = vpack.c.bf16 %v519_v5, %v519_v5  ;;  %540 = vtanh.f32 %v240_v3 }
  0xeb   :  { %v523_v9 = vpop.eup %522  ;;  %365 = vrot.lane.b32.xlu1 %v461_v6, %s546_s0  ;;  %340 = vst.msk [vmem:[%s789_s3 + $0x24] sm:$0xf] %vm330_vm1, %v461_v6  ;;  %542 = vtanh.f32 %v249_v0  ;;  %v460_v10 = vpack.c.bf16 %v521_v7, %v521_v7 }
  0xec   :  { %v525_v11 = vpop.eup %524  ;;  %v455_v12 = vpack.c.bf16 %v523_v9, %v523_v9  ;;  %331 = vst.msk [vmem:[%s789_s3] sm:$0xf] %vm330_vm1, %v452_v8  ;;  %544 = vtanh.f32 %v248_v4 }
  0xed   :  { %v527_v13 = vpop.eup %526  ;;  %339 = vst.msk [vmem:[%s789_s3 + $0x20] sm:$0xf] %vm330_vm1, %v460_v10  ;;  %v454_v14 = vpack.c.bf16 %v525_v11, %v525_v11 }
  0xee   :  { %v529_v15 = vpop.eup %528  ;;  %334 = vst.msk [vmem:[%s789_s3 + $0xc] sm:$0xf] %vm330_vm1, %v455_v12  ;;  %347 = vrot.lane.b32.xlu0 %v452_v8, %s546_s0  ;;  %v463_v16 = vpack.c.bf16 %v527_v13, %v527_v13 }
  0xef   :  { %v531_v17 = vpop.eup %530  ;;  %353 = vrot.lane.b32.xlu1 %v455_v12, %s546_s0  ;;  %333 = vst.msk [vmem:[%s789_s3 + $0x8] sm:$0xf] %vm330_vm1, %v454_v14  ;;  %v462_v18 = vpack.c.bf16 %v529_v15, %v529_v15 }
  0xf0   :  { %v533_v19 = vpop.eup %532  ;;  %342 = vst.msk [vmem:[%s789_s3 + $0x2c] sm:$0xf] %vm330_vm1, %v463_v16  ;;  %v457_v20 = vpack.c.bf16 %v531_v17, %v531_v17 }
  0xf1   :  { %v535_v21 = vpop.eup %534  ;;  %341 = vst.msk [vmem:[%s789_s3 + $0x28] sm:$0xf] %vm330_vm1, %v462_v18  ;;  %v456_v22 = vpack.c.bf16 %v533_v19, %v533_v19 }
  0xf2   :  { %v537_v23 = vpop.eup %536  ;;  %363 = vrot.lane.b32.xlu0 %v460_v10, %s546_s0  ;;  %336 = vst.msk [vmem:[%s789_s3 + $0x14] sm:$0xf] %vm330_vm1, %v457_v20  ;;  %v465_v24 = vpack.c.bf16 %v535_v21, %v535_v21 }
  0xf3   :  { %v539_v25 = vpop.eup %538  ;;  %369 = vrot.lane.b32.xlu1 %v463_v16, %s546_s0  ;;  %335 = vst.msk [vmem:[%s789_s3 + $0x10] sm:$0xf] %vm330_vm1, %v456_v22  ;;  %v464_v26 = vpack.c.bf16 %v537_v23, %v537_v23 }
  0xf4   :  { %v541_v27 = vpop.eup %540  ;;  %344 = vst.msk [vmem:[%s789_s3 + $0x34] sm:$0xf] %vm330_vm1, %v465_v24  ;;  %v459_v28 = vpack.c.bf16 %v539_v25, %v539_v25 }
  0xf5   :  { %v543_v29 = vpop.eup %542  ;;  %343 = vst.msk [vmem:[%s789_s3 + $0x30] sm:$0xf] %vm330_vm1, %v464_v26  ;;  %v458_v30 = vpack.c.bf16 %v541_v27, %v541_v27 }
  0xf6   :  { %v545_v31 = vpop.eup %544  ;;  %367 = vrot.lane.b32.xlu0 %v462_v18, %s546_s0  ;;  %338 = vst.msk [vmem:[%s789_s3 + $0x1c] sm:$0xf] %vm330_vm1, %v459_v28  ;;  %v467_v32 = vpack.c.bf16 %v543_v29, %v543_v29 }
  0xf7   :  { %351 = vrot.lane.b32.xlu1 %v454_v14, %s546_s0  ;;  %337 = vst.msk [vmem:[%s789_s3 + $0x18] sm:$0xf] %vm330_vm1, %v458_v30  ;;  %v466_v33 = vpack.c.bf16 %v545_v31, %v545_v31 }
  0xf8   :  { %346 = vst.msk [vmem:[%s789_s3 + $0x3c] sm:$0xf] %vm330_vm1, %v467_v32 }
  0xf9   :  { %345 = vst.msk [vmem:[%s789_s3 + $0x38] sm:$0xf] %vm330_vm1, %v466_v33 }
  0xfa   :  { %355 = vrot.lane.b32.xlu0 %v456_v22, %s546_s0 }
  0xfb   :  { %357 = vrot.lane.b32.xlu1 %v457_v20, %s546_s0 }
  0xfe   :  { %371 = vrot.lane.b32.xlu0 %v464_v26, %s546_s0 }
  0xff   :  { %373 = vrot.lane.b32.xlu1 %v465_v24, %s546_s0 }
 0x102   :  { %359 = vrot.lane.b32.xlu0 %v458_v30, %s546_s0 }
 0x103   :  { %361 = vrot.lane.b32.xlu1 %v459_v28, %s546_s0 }
 0x106   :  { %375 = vrot.lane.b32.xlu0 %v466_v33, %s546_s0 }
 0x107   :  { %377 = vrot.lane.b32.xlu1 %v467_v32, %s546_s0 }
 0x15c   :  { %v350_v34 = vpop.permute.xlu0 %349 }
 0x15d   :  { %v366_v35 = vpop.permute.xlu1 %365  ;;  %396 = vst.msk [vmem:[%s790_s4 + $0x4] sm:$0xf] %vm330_vm1, %v350_v34 }
 0x15e   :  { %404 = vst.msk [vmem:[%s790_s4 + $0x24] sm:$0xf] %vm330_vm1, %v366_v35 }
 0x160   :  { %v348_v36 = vpop.permute.xlu0 %347 }
 0x161   :  { %v354_v37 = vpop.permute.xlu1 %353  ;;  %395 = vst.msk [vmem:[%s790_s4] sm:$0xf] %vm330_vm1, %v348_v36 }
 0x162   :  { %398 = vst.msk [vmem:[%s790_s4 + $0xc] sm:$0xf] %vm330_vm1, %v354_v37 }
 0x164   :  { %v364_v38 = vpop.permute.xlu0 %363 }
 0x165   :  { %v370_v39 = vpop.permute.xlu1 %369  ;;  %403 = vst.msk [vmem:[%s790_s4 + $0x20] sm:$0xf] %vm330_vm1, %v364_v38 }
 0x166   :  { %406 = vst.msk [vmem:[%s790_s4 + $0x2c] sm:$0xf] %vm330_vm1, %v370_v39 }
 0x168   :  { %v368_v40 = vpop.permute.xlu0 %367 }
 0x169   :  { %v352_v41 = vpop.permute.xlu1 %351  ;;  %405 = vst.msk [vmem:[%s790_s4 + $0x28] sm:$0xf] %vm330_vm1, %v368_v40 }
 0x16a   :  { %397 = vst.msk [vmem:[%s790_s4 + $0x8] sm:$0xf] %vm330_vm1, %v352_v41 }
 0x16c   :  { %v356_v42 = vpop.permute.xlu0 %355 }
 0x16d   :  { %v358_v43 = vpop.permute.xlu1 %357  ;;  %399 = vst.msk [vmem:[%s790_s4 + $0x10] sm:$0xf] %vm330_vm1, %v356_v42 }
 0x16e   :  { %400 = vst.msk [vmem:[%s790_s4 + $0x14] sm:$0xf] %vm330_vm1, %v358_v43 }
 0x170   :  { %v372_v44 = vpop.permute.xlu0 %371 }
 0x171   :  { %v374_v45 = vpop.permute.xlu1 %373  ;;  %407 = vst.msk [vmem:[%s790_s4 + $0x30] sm:$0xf] %vm330_vm1, %v372_v44 }
 0x172   :  { %408 = vst.msk [vmem:[%s790_s4 + $0x34] sm:$0xf] %vm330_vm1, %v374_v45 }
 0x174   :  { %v360_v46 = vpop.permute.xlu0 %359 }
 0x175   :  { %v362_v47 = vpop.permute.xlu1 %361  ;;  %401 = vst.msk [vmem:[%s790_s4 + $0x18] sm:$0xf] %vm330_vm1, %v360_v46 }
 0x176   :  { %402 = vst.msk [vmem:[%s790_s4 + $0x1c] sm:$0xf] %vm330_vm1, %v362_v47 }
 0x178   :  { %v376_v48 = vpop.permute.xlu0 %375 }
 0x179   :  { %v378_v49 = vpop.permute.xlu1 %377  ;;  %409 = vst.msk [vmem:[%s790_s4 + $0x38] sm:$0xf] %vm330_vm1, %v376_v48 }
 0x17a   :  { %410 = vst.msk [vmem:[%s790_s4 + $0x3c] sm:$0xf] %vm330_vm1, %v378_v49 }

</bundles_post_ra>
